<compile_context>
chip_gen: v5e
topology: v5e:2x2
jax: 0.10.0
libtpu: 0.0.40
codegen_flags: <defaults>
</compile_context>

<pallas_src>
import math

import jax
import jax.numpy as jnp
from jax.experimental import pallas as pl
from jax.experimental.pallas import tpu as pltpu


_LANES = 1024          # lane-dense last dim (8x the 128-lane vreg width)
_MAX_BLOCK_ROWS = 512  # 512 x 1024 x 4 B = 2 MiB f32 tile; double-buffered
                       # in + out tiles stay far under v7x's 32 MiB scoped VMEM.


def _encoder_copy_kernel(x_ref, o_ref):
    # One lane-dense (block_rows, 1024) tile resident in VMEM; single
    # contiguous unmasked store (friendliest to v5e's lone vst slot).
    o_ref[...] = x_ref[...]


@jax.jit
def encoder_forward(x: jax.Array) -> jax.Array:
    """Forward pass of the (abstract) Encoder: pass-through over X.

    x: (N, C, H, W) array (NCHW, matching the PyTorch convention).
    Returns an array with identical shape/dtype/values.
    """
    orig_shape = x.shape
    total = math.prod(orig_shape)

    # Lane-dense 2-D view: (rows, 1024), padded so rows divides evenly into
    # sublane-aligned blocks of at most _MAX_BLOCK_ROWS.
    rows = pl.cdiv(total, _LANES)
    block_rows = min(_MAX_BLOCK_ROWS, ((rows + 7) // 8) * 8)   # multiple of 8
    rows_padded = ((rows + block_rows - 1) // block_rows) * block_rows
    pad = rows_padded * _LANES - total

    flat = x.reshape(total)
    if pad:
        flat = jnp.pad(flat, (0, pad))
    x2d = flat.reshape(rows_padded, _LANES)

    grid = (rows_padded // block_rows,)

    out2d = pl.pallas_call(
        _encoder_copy_kernel,
        out_shape=jax.ShapeDtypeStruct(x2d.shape, x2d.dtype),
        grid=grid,
        in_specs=[pl.BlockSpec((block_rows, _LANES), lambda i: (i, 0))],
        out_specs=pl.BlockSpec((block_rows, _LANES), lambda i: (i, 0)),
        compiler_params=pltpu.CompilerParams(
            dimension_semantics=("parallel",),
        ),
    )(x2d)

    return out2d.reshape(rows_padded * _LANES)[:total].reshape(orig_shape)


if __name__ == "__main__":
    key = jax.random.PRNGKey(0)

    # Primary small NCHW input consistent with a typical encoder:
    # batch=2, channels=4, spatial=16x16.
    x = jax.random.normal(key, (2, 4, 16, 16), dtype=jnp.float32)
    y = jax.block_until_ready(encoder_forward(x))
    assert y.shape == x.shape and y.dtype == x.dtype
    assert bool(jnp.allclose(y, x)), "identity forward mismatch (primary)"

    # Ragged shape: exercises the pad/crop tail path.
    k1, k2 = jax.random.split(key)
    x_ragged = jax.random.normal(k1, (3, 5, 17, 19), dtype=jnp.float32)
    y_ragged = jax.block_until_ready(encoder_forward(x_ragged))
    assert bool(jnp.allclose(y_ragged, x_ragged)), "identity forward mismatch (ragged)"

    # Larger shape: exercises the multi-block, auto-pipelined grid (grid=(2,)).
    x_big = jax.random.normal(k2, (2, 4, 512, 256), dtype=jnp.float32)
    y_big = jax.block_until_ready(encoder_forward(x_big))
    assert bool(jnp.allclose(y_big, x_big)), "identity forward mismatch (tiled)"

    print("KERNEL_OK")
</pallas_src>

<mosaic_0001>
module attributes {stable_mosaic.version = 11 : i64} {
  func.func @_encoder_copy_kernel(%arg0: i32, %arg1: memref<8x1024xf32, #tpu.memory_space<vmem>>, %arg2: memref<8x1024xf32, #tpu.memory_space<vmem>>) attributes {dimension_semantics = [#tpu.dimension_semantics<parallel>], iteration_bounds = array<i64: 1>, scalar_prefetch = 0 : i64, scratch_operands = 0 : i64, tpu.core_type = #tpu.core_type<tc>, window_params = [{transform_indices = @transform_0, window_bounds = array<i64: 8, 1024>}, {transform_indices = @transform_1, window_bounds = array<i64: 8, 1024>}]} {
    %c0 = arith.constant 0 : index
    %c0_0 = arith.constant 0 : index
    %0 = vector.load %arg1[%c0, %c0_0] : memref<8x1024xf32, #tpu.memory_space<vmem>>, vector<8x1024xf32>
    %c0_1 = arith.constant 0 : index
    %c0_2 = arith.constant 0 : index
    %1 = vector.load %arg2[%c0_1, %c0_2] : memref<8x1024xf32, #tpu.memory_space<vmem>>, vector<8x1024xf32>
    tpu.vector_store %arg2[%c0_1, %c0_2], %0 {strides = array<i32>} : memref<8x1024xf32, #tpu.memory_space<vmem>>, vector<8x1024xf32>,
    return
  }
  func.func @transform_0(%arg0: i32) -> (i32, i32) {
    %c0_i32 = arith.constant 0 : i32
    %c0_i32_0 = arith.constant 0 : i32
    return %arg0, %c0_i32 : i32, i32
  }
  func.func @transform_1(%arg0: i32) -> (i32, i32) {
    %c0_i32 = arith.constant 0 : i32
    %c0_i32_0 = arith.constant 0 : i32
    return %arg0, %c0_i32 : i32, i32
  }
}

</mosaic_0001>

<bundles_post_ra>
// kernel: encoder_forward.1
= control target key start
LH: loop header
LB: loop body
LE: loop exit
PB: predicated region body
PF: predicated region fallthrough
CT: control target
= control target key end

     0   :  { %s86_s0 = inlined_call_operand.vmem [shape: f32[8,1024], index: 0, kind: input, shape index: {}]   ;;  %s87_s1 = inlined_call_operand.vmem [shape: f32[8,1024], index: 1, kind: output, shape index: {}]  }
   0x1   :  { %v8_v0 = vld [vmem:[%s86_s0] sm:$0xff]  ;;  %v9_v1 = vld [vmem:[%s86_s0 + $0x8] sm:$0xff]  ;;  %v10_v2 = vld [vmem:[%s86_s0 + $0x10] sm:$0xff] }
   0x2   :  { %16 = vst [vmem:[%s87_s1] sm:$0xff] %v8_v0  ;;  %v11_v3 = vld [vmem:[%s86_s0 + $0x18] sm:$0xff]  ;;  %v12_v4 = vld [vmem:[%s86_s0 + $0x20] sm:$0xff]  ;;  %v13_v5 = vld [vmem:[%s86_s0 + $0x28] sm:$0xff] }
   0x3   :  { %17 = vst [vmem:[%s87_s1 + $0x8] sm:$0xff] %v9_v1  ;;  %v14_v6 = vld [vmem:[%s86_s0 + $0x30] sm:$0xff]  ;;  %v15_v7 = vld [vmem:[%s86_s0 + $0x38] sm:$0xff] }
   0x4   :  { %18 = vst [vmem:[%s87_s1 + $0x10] sm:$0xff] %v10_v2 }
   0x5   :  { %19 = vst [vmem:[%s87_s1 + $0x18] sm:$0xff] %v11_v3 }
   0x6   :  { %20 = vst [vmem:[%s87_s1 + $0x20] sm:$0xff] %v12_v4 }
   0x7   :  { %21 = vst [vmem:[%s87_s1 + $0x28] sm:$0xff] %v13_v5 }
   0x8   :  { %22 = vst [vmem:[%s87_s1 + $0x30] sm:$0xff] %v14_v6 }
   0x9   :  { %23 = vst [vmem:[%s87_s1 + $0x38] sm:$0xff] %v15_v7 }

</bundles_post_ra>
